<compile_context>
chip_gen: v7x
topology: tpu7x:2x2x1
jax: 0.10.0
libtpu: 0.0.40
codegen_flags: <defaults>
</compile_context>

<pallas_src>
import jax
import jax.numpy as jnp
from jax.experimental import pallas as pl
from jax.experimental.pallas import tpu as pltpu


def _chomp2d_kernel(x_ref, o_ref):
    # x_ref: (B_tile, H_blk, W_blk)   o_ref: (B_tile, H_out, W_out)
    # When the BlockSpec already expresses the chomp (H_blk == H_out and
    # W_blk == W_out) this slice is a no-op; otherwise it drops the few
    # leftover rows/cols in VMEM.
    h_out = o_ref.shape[1]
    w_out = o_ref.shape[2]
    o_ref[...] = x_ref[:, :h_out, :w_out]


def _round_up(n: int, m: int) -> int:
    return (n + m - 1) // m * m


def _sublane_multiple(dtype) -> int:
    # Native sublane packing: 8 for 32-bit, 16 for 16-bit, 32 for 8-bit.
    bits = jnp.dtype(dtype).itemsize * 8
    return max(8, 256 // bits)


def chomp2d(x, chomp_size: int):
    """Pallas equivalent of Chomp2d(chomp_size).forward(x) for NCHW input."""
    N, C, H, W = x.shape
    assert 0 < chomp_size < H and chomp_size < W, (chomp_size, H, W)
    H_out, W_out = H - chomp_size, W - chomp_size

    NC = N * C
    x_flat = x.reshape(NC, H, W)

    itemsize = jnp.dtype(x.dtype).itemsize
    sub = _sublane_multiple(x.dtype)

    # Input block: round the chomped extents UP to (sublane, lane) multiples
    # so the block stays tile-legal while skipping as many chomped rows/cols
    # as possible at the DMA level.  Fall back to the full extent only when
    # rounding reaches/exceeds it (the full extent is always legal).
    H_blk = H if _round_up(H_out, sub) >= H else _round_up(H_out, sub)
    W_blk = W if _round_up(W_out, 128) >= W else _round_up(W_out, 128)

    # VMEM budgeting with PADDED tile sizes (Mosaic pads the last two block
    # dims to the dtype's (sublane, 128) tile).
    in_plane_padded = _round_up(H_blk, sub) * _round_up(W_blk, 128) * itemsize
    out_plane_padded = _round_up(H_out, sub) * _round_up(W_out, 128) * itemsize
    plane_bytes = max(in_plane_padded, out_plane_padded)

    # ~2 MiB (padded) per buffer: near HBM roofline on all generations and,
    # with double-buffered in+out (~8 MiB total), comfortably inside every
    # generation's default scoped-VMEM budget — no vmem_limit override needed.
    target_bytes = 2 * 1024 * 1024
    cap = max(1, target_bytes // plane_bytes)
    # Keep >=4 grid steps when NC permits (v7x: 2 TCs x >=2 steps each).
    min_steps = min(NC, 4)
    cap = min(cap, max(1, NC // min_steps))
    B_tile = min(NC, cap)

    grid = (pl.cdiv(NC, B_tile),)  # ragged last block is fine for a pure copy

    bytes_accessed = NC * (H_blk * W_blk + H_out * W_out) * itemsize

    out_flat = pl.pallas_call(
        _chomp2d_kernel,
        out_shape=jax.ShapeDtypeStruct((NC, H_out, W_out), x.dtype),
        grid=grid,
        in_specs=[
            pl.BlockSpec((B_tile, H_blk, W_blk), lambda b: (b, 0, 0)),
        ],
        out_specs=pl.BlockSpec((B_tile, H_out, W_out), lambda b: (b, 0, 0)),
        compiler_params=pltpu.CompilerParams(
            dimension_semantics=("parallel",),
        ),
        cost_estimate=pl.CostEstimate(
            flops=0, transcendentals=0, bytes_accessed=bytes_accessed),
    )(x_flat)

    return out_flat.reshape(N, C, H_out, W_out)


def _check(N, C, H, W, chomp_size, key):
    x = jax.random.normal(key, (N, C, H, W), dtype=jnp.float32)
    y = jax.block_until_ready(chomp2d(x, chomp_size))
    y_ref = x[:, :, :-chomp_size, :-chomp_size]
    assert y.shape == (N, C, H - chomp_size, W - chomp_size), y.shape
    assert y.dtype == x.dtype
    assert jnp.array_equal(y, y_ref), f"mismatch vs reference for {(N, C, H, W)}"


if __name__ == "__main__":
    key = jax.random.PRNGKey(0)
    k0, k1, k2 = jax.random.split(key, 3)

    # Primary module-consistent small shape.
    _check(2, 4, 16, 16, 2, k0)
    # Exercises the rounded-up H block fast path (H_blk = 32 < H = 40).
    _check(1, 3, 40, 40, 9, k1)
    # Exercises the ragged last grid block (NC = 9, B_tile = 2 -> 5 steps).
    _check(9, 1, 16, 16, 3, k2)

    print("KERNEL_OK")
</pallas_src>

<mosaic_0001>
module attributes {stable_mosaic.version = 11 : i64} {
  func.func @_chomp2d_kernel(%arg0: i32, %arg1: memref<2x16x16xf32, #tpu.memory_space<vmem>>, %arg2: memref<2x14x14xf32, #tpu.memory_space<vmem>>) attributes {dimension_semantics = [#tpu.dimension_semantics<parallel>], iteration_bounds = array<i64: 4>, scalar_prefetch = 0 : i64, scratch_operands = 0 : i64, tpu.core_type = #tpu.core_type<tc>, window_params = [{transform_indices = @transform_0, window_bounds = array<i64: 2, 16, 16>}, {transform_indices = @transform_1, window_bounds = array<i64: 2, 14, 14>}]} {
    %c0 = arith.constant 0 : index
    %c0_0 = arith.constant 0 : index
    %c0_1 = arith.constant 0 : index
    %0 = vector.load %arg1[%c0, %c0_0, %c0_1] : memref<2x16x16xf32, #tpu.memory_space<vmem>>, vector<2x14x14xf32>
    %c0_2 = arith.constant 0 : index
    %c0_3 = arith.constant 0 : index
    %c0_4 = arith.constant 0 : index
    %1 = vector.load %arg2[%c0_2, %c0_3, %c0_4] : memref<2x14x14xf32, #tpu.memory_space<vmem>>, vector<2x14x14xf32>
    tpu.vector_store %arg2[%c0_2, %c0_3, %c0_4], %0 {strides = array<i32>} : memref<2x14x14xf32, #tpu.memory_space<vmem>>, vector<2x14x14xf32>,
    return
  }
  func.func @transform_0(%arg0: i32) -> (i32, i32, i32) {
    %c0_i32 = arith.constant 0 : i32
    %c0_i32_0 = arith.constant 0 : i32
    %c0_i32_1 = arith.constant 0 : i32
    return %arg0, %c0_i32, %c0_i32_0 : i32, i32, i32
  }
  func.func @transform_1(%arg0: i32) -> (i32, i32, i32) {
    %c0_i32 = arith.constant 0 : i32
    %c0_i32_0 = arith.constant 0 : i32
    %c0_i32_1 = arith.constant 0 : i32
    return %arg0, %c0_i32, %c0_i32_0 : i32, i32, i32
  }
}

</mosaic_0001>

<bundles_post_ra>
// kernel: tpu_custom_call.1
= control target key start
LH: loop header
LB: loop body
LE: loop exit
PB: predicated region body
PF: predicated region fallthrough
CT: control target
= control target key end

     0   :  { %6 = vsyncpa [#allocation3], 0  ;;  %s466_s0 = inlined_call_operand.hbm [shape: f32[8,16,16], index: 0, kind: input, shape index: {}]   ;;  %s467_s1 = inlined_call_operand.vmem [shape: f32[8,14,14], index: 1, kind: output, shape index: {}]  }
   0x1   :  { %8 = vsyncpa [#allocation3 + $0x1], 0  ;;  %s359_s6 = smov 0   ;;  %s361_s7 = smov 0  }
   0x2   :  { %s363_s8 = smov 0   ;;  %s365_s9 = smov 0  }
   0x3 LB: > { %s221_s10 = sadd.s32 4294967295, %s344_s9   ;;  %s379_s11 = sadd.s32 1, %s344_s9   ;;  %s344_s9 = sphi %s365_s9, %s474_s9   ;;  %s340_s8 = sphi %s363_s8, %s473_s8   ;;  %s336_s7 = sphi %s361_s7, %s472_s7   ;;  %s332_s6 = sphi %s359_s6, %s471_s6  }
   0x4   : > { %s18_s12 = ssub.s32 %s344_s9, %s379_s11  ;;  %s21_s13 = sadd.s32 1, %s340_s8 }
   0x5   : > { %p19_p0 = scmp.eq.s32.totalorder %s18_s12, 0  ;;  %p28_p1 = scmp.ne.s32.totalorder %s340_s8, %s336_s7 }
   0x6   : > { %p29_p2 = scmp.eq.s32.totalorder %s344_s9, 0  ;;  %p34_p3 = scmp.ne.s32.totalorder %s336_s7, %s332_s6 }
   0x7   : > { %s389_s14 = scalar_select %p19_p0, %s340_s8, %s21_s13  }
   0x8   : > { %p30_p4 = por %p29_p2, %p28_p1  ;;  %p35_p5 = scmp.eq.s32.totalorder %s221_s10, 0 }
   0x9   : > { %p245_p6 = scmp.lt.s32.totalorder %s344_s9, 4  ;;  %s84_s16 = sand.u32 1, %s340_s8  }
   0xa   : > { %p394_p7 = por %p35_p5, %p34_p3  ;;  %s225_s17 = sshll.u32 %s84_s16, 5 }
   0xb   : > { %s237_s18 = sshll.u32 %s344_s9, 9  ;;  %s88_s22 = scalar_lea.vmem [#allocation2], %s225_s17 }
   0xc   : > { %s403_s21 = scalar_lea.hbm %s466_s0, %s237_s18  ;;  %s96_s23 = sshll.u32 %s88_s22, 4  ;;  %s405_s23 = int_to_ptr.vmem [resolvable:$true] %s96_s23 }
   0xd   : > { %p407_p8 = pnand %p245_p6, %p30_p4  ;;  %s412_s25 = scalar_lea.sflag [#allocation3], %s84_s16 }
   0xe   : > { %s280_s26 = scalar_lea.hbm %s403_s21, 512  ;;  %s285_s29 = scalar_lea.hbm %s466_s0, 2048 }
   0xf   : > { %p281_p10 = scmp.ne.s32.totalorder %s403_s21, %s280_s26  ;;  %p282_p11 = pneg %p407_p8 }
  0x10   : > { %p286_p0 = scmp.lt.u32.totalorder %s403_s21, %s466_s0  ;;  %p287_p1 = scmp.lt.u32.totalorder %s285_s29, %s280_s26 }
  0x11   : > { %p283_p12 = pnand %p282_p11, %p281_p10  ;;  %p289_p3 = scmp.lt.u32.totalorder %s280_s26, %s403_s21 }
  0x12   : > { %p288_p2 = por %p287_p1, %p286_p0 }
  0x13   : > { %p284_p13 = pneg %p283_p12 }
  0x14   : > { %p290_p4 = por %p289_p3, %p288_p2 }
  0x16   : > { %p291_p5 = pnand %p290_p4, %p284_p13 }
  0x18   : > { %294 = shalt.err (!%p291_p5)
}
  0x19   : > { %s295_s3 = scalar_lea.vmem %s405_s23, 512  ;;  %s346_s4 = smov [#allocation2]  }
  0x1a   : > { %p296_p6 = scmp.ne.s32.totalorder %s405_s23, %s295_s3  ;;  %s300_s5 = sshll.u32 %s346_s4, 4  ;;  %s301_s5 = int_to_ptr.vmem [resolvable:$false] %s300_s5 }
  0x1b   : > { %s302_s6 = scalar_lea.vmem %s301_s5, 1024  ;;  %p303_p9 = scmp.lt.s32.totalorder %s405_s23, %s301_s5 }
  0x1c   : > { %p298_p10 = pnand %p296_p6, %p282_p11  ;;  %p304_p0 = scmp.lt.s32.totalorder %s302_s6, %s295_s3 }
  0x1e   : > { %p299_p12 = pneg %p298_p10  ;;  %p305_p1 = por %p304_p0, %p303_p9 }
  0x20   : > { %p306_p2 = pnand %p305_p1, %p299_p12 }
  0x22   : > { %309 = shalt.err (!%p306_p2)
}
  0x23   : > { %s347_s12 = smov 128   ;;  %s348_s13 = smov 8  }
  0x24   : > { %244 = dma.hbm_to_vmem [thread:$0]  (!%p407_p8), %s403_s21, 512, %s405_s23, %s412_s25, %s347_s12, %s347_s12, %s348_s13  }
  0x25   : > { %p104_p11 = scmp.lt.s32.totalorder %s344_s9, 5  ;;  %p470_p13 = scmp.ge.s32.totalorder %s344_s9, 1 }
  0x27   : > { %p105_p3 = pnand %p470_p13, %p104_p11 }
  0x28   : > { %s110_s16 = sand.u32 (!%p105_p3), 1, %s336_s7  }
  0x29   : > { %108 = sbr.rel (%p105_p3) target bundleno = 57 (0x39), region = 24  ;;  %s230_s17 = sshll.u32 (!%p105_p3), %s110_s16, 5 }
  0x2a   : > { %s111_s18 = scalar_lea.sflag (!%p105_p3), [#allocation3], %s110_s16  ;;  %s114_s19 = scalar_lea.vmem (!%p105_p3), [#allocation2], %s230_s17 }
  0x30   : > { %327 = dma.done.wait (%p394_p7), %s111_s18, 512  }
  0x31   : > { %329 = vsyncadd (%p394_p7), %s111_s18, 4294966784  ;;  %s231_s20 = sshll.u32 %s221_s10, 1  ;;  %vm146_vm0 = vcmask 113664   ;;  %vm148_vm1 = vcmask 111616   ;;  %v142_v0 = vld [vmem:[%s114_s19] sm:$0xff]  ;;  %v144_v2 = vld [vmem:[%s114_s19 + $0x10] sm:$0xff] }
  0x32   : > { %p136_p9 = scmp.lt.s32.totalorder %s231_s20, 7  ;;  %v143_v1 = vld [vmem:[%s114_s19 + $0x8] sm:$0x3f]  ;;  %v145_v3 = vld [vmem:[%s114_s19 + $0x18] sm:$0x3f] }
  0x34   : > { %s476_s20 = smov (!%p136_p9, %s231_s20), 7 }
  0x35   : > { %s238_s21 = sshll.u32 %s476_s20, 4 }
  0x36   : > { %s140_s24 = scalar_lea.vmem %s467_s1, %s238_s21 }
  0x37   : > { %147 = vst.msk [vmem:[%s140_s24] sm:$0xff] %vm146_vm0, %v142_v0  ;;  %150 = vst.msk [vmem:[%s140_s24 + $0x10] sm:$0xff] %vm146_vm0, %v144_v2 }
  0x38   : > { %149 = vst.msk [vmem:[%s140_s24 + $0x8] sm:$0x3f] %vm148_vm1, %v143_v1  ;;  %151 = vst.msk [vmem:[%s140_s24 + $0x18] sm:$0x3f] %vm148_vm1, %v145_v3 }
  0x39 PF: > { %p11_p7 = scmp.ge.s32.totalorder %s379_s11, 6   ;;  %s471_s6 = smov %s336_s7 }
  0x3a   : > { %s472_s7 = smov %s340_s8  ;;  %s473_s8 = smov %s389_s14 }
  0x3b   : > { %s474_s9 = smov %s379_s11  ;;  %13 = sbr.rel (!%p11_p7) target bundleno = 3 (0x3), region = 64 }
  0x42   :  { %176 = vsyncpa [#allocation3], 1 }
  0x43   :  { %178 = vsyncpa [#allocation3 + $0x1], 1 }

</bundles_post_ra>
